<compile_context>
chip_gen: v6e
topology: v6e:2x2x1
jax: 0.10.0
libtpu: 0.0.40
codegen_flags: <defaults>
</compile_context>

<pallas_src>
import functools

import jax
import jax.numpy as jnp
import numpy as np
from jax.experimental import pallas as pl
from jax.experimental.pallas import tpu as pltpu


def conv_meanpool_kernel(w_ref, b_ref, x_ref, o_ref):
    # w_ref: (Cout, K)      fused stride-2 conv weights (pool folded in)
    # b_ref: (Cout, 1)      bias
    # x_ref: (K, TILE_M)    stride-2 im2col columns (lane axis = spatial)
    # o_ref: (Cout, TILE_M) lane-dense output tile
    acc = jnp.dot(w_ref[...], x_ref[...], preferred_element_type=jnp.float32)
    o_ref[...] = (acc + b_ref[...]).astype(o_ref.dtype)


def _round_up(x, m):
    return ((x + m - 1) // m) * m


@functools.partial(jax.jit, static_argnames=("kernel_size",))
def conv_mean_pool(x, weight, bias, kernel_size):
    """x: (N, Cin, H, W) NCHW f32. weight: (Cout, Cin, k, k). bias: (Cout,)."""
    N, Cin, H, W = x.shape
    Cout = weight.shape[0]
    k = kernel_size
    assert k % 2 == 1
    assert H % 2 == 0 and W % 2 == 0
    pad = (k - 1) // 2
    Ho, Wo = H // 2, W // 2
    ke = k + 1                       # effective stride-2 kernel extent
    K = ke * ke * Cin                # fused contraction dim
    M = N * Ho * Wo                  # lane (spatial) dim of the output

    # ---- fold the 2x2 mean pool into the conv weights ----------------------
    # W_eff[o, c, u, v] = 0.25 * sum_{di,dj in {0,1}} weight[o, c, u-di, v-dj]
    w_eff = 0.25 * (
        jnp.pad(weight, ((0, 0), (0, 0), (0, 1), (0, 1)))
        + jnp.pad(weight, ((0, 0), (0, 0), (1, 0), (0, 1)))
        + jnp.pad(weight, ((0, 0), (0, 0), (0, 1), (1, 0)))
        + jnp.pad(weight, ((0, 0), (0, 0), (1, 0), (1, 0)))
    )                                                        # (Cout, Cin, ke, ke)
    # row ordering r = (u*ke + v)*Cin + c, matching the im2col below
    w_mat = jnp.transpose(w_eff, (0, 2, 3, 1)).reshape(Cout, K)
    b2 = bias.reshape(Cout, 1)

    # ---- stride-2 im2col over the OUTPUT grid (4x fewer rows, no P matrix) --
    x_nhwc = jnp.transpose(x, (0, 2, 3, 1))                  # (N, H, W, Cin)
    x_pad = jnp.pad(x_nhwc, ((0, 0), (pad, pad), (pad, pad), (0, 0)))
    taps = []
    for u in range(ke):
        for v in range(ke):
            taps.append(
                jax.lax.slice(
                    x_pad,
                    (0, u, v, 0),
                    (N, u + 2 * (Ho - 1) + 1, v + 2 * (Wo - 1) + 1, Cin),
                    (1, 2, 2, 1),
                )
            )                                                # (N, Ho, Wo, Cin)
    # rows r = (u*ke+v)*Cin + c ; columns m = n*Ho*Wo + i*Wo + j
    xcol = jnp.stack(taps, axis=0)                           # (ke*ke, N, Ho, Wo, Cin)
    xcol = jnp.transpose(xcol, (0, 4, 1, 2, 3)).reshape(K, M)

    # ---- lane-dense tiling of the column (spatial) axis ---------------------
    # Keep the double-buffered X block comfortably inside VMEM on all chips
    # (v7x has 64 MiB physical / 32 MiB scoped default).
    max_tile_by_vmem = max(128, ((4 << 20) // (K * 4)) // 128 * 128)
    tile_m = min(_round_up(M, 128), 2048, max_tile_by_vmem)
    m_pad = _round_up(M, tile_m)
    if m_pad != M:
        xcol = jnp.pad(xcol, ((0, 0), (0, m_pad - M)))

    out_flat = pl.pallas_call(
        conv_meanpool_kernel,
        out_shape=jax.ShapeDtypeStruct((Cout, m_pad), x.dtype),
        grid_spec=pltpu.PrefetchScalarGridSpec(
            num_scalar_prefetch=0,
            grid=(m_pad // tile_m,),
            in_specs=[
                pl.BlockSpec((Cout, K), lambda g: (0, 0)),      # weights (resident)
                pl.BlockSpec((Cout, 1), lambda g: (0, 0)),      # bias
                pl.BlockSpec((K, tile_m), lambda g: (0, g)),    # im2col columns
            ],
            out_specs=pl.BlockSpec((Cout, tile_m), lambda g: (0, g)),
        ),
        compiler_params=pltpu.CompilerParams(
            dimension_semantics=("parallel",),
        ),
    )(w_mat, b2, xcol)

    # back to NCHW: columns are ordered (n, i, j)
    out = out_flat[:, :M].reshape(Cout, N, Ho, Wo)
    return jnp.transpose(out, (1, 0, 2, 3))


if __name__ == "__main__":
    # ConvMeanPool(input_dim=4, output_dim=8, kernel_size=3) on x: (2, 4, 16, 16)
    N, Cin, H, W = 2, 4, 16, 16
    Cout, k = 8, 3

    key = jax.random.PRNGKey(0)
    kx, kw, kb = jax.random.split(key, 3)
    x = jax.random.normal(kx, (N, Cin, H, W), dtype=jnp.float32)
    # Deterministic synthetic parameters (same shapes as nn.Conv2d(4, 8, 3)).
    weight = jax.random.normal(kw, (Cout, Cin, k, k), dtype=jnp.float32) * 0.1
    bias = jax.random.normal(kb, (Cout,), dtype=jnp.float32) * 0.1

    out = conv_mean_pool(x, weight, bias, k)
    out = jax.block_until_ready(out)
    assert out.shape == (N, Cout, H // 2, W // 2), out.shape

    # Reference in plain JAX (same-padding conv + 2x2 mean pool).
    ref_conv = jax.lax.conv_general_dilated(
        x, weight, window_strides=(1, 1), padding="SAME",
        dimension_numbers=("NCHW", "OIHW", "NCHW"),
        precision=jax.lax.Precision.HIGHEST,
    ) + bias.reshape(1, Cout, 1, 1)
    ref = ref_conv.reshape(N, Cout, H // 2, 2, W // 2, 2).mean(axis=(3, 5))

    if not np.allclose(np.asarray(out), np.asarray(ref), atol=1e-4, rtol=1e-4):
        raise AssertionError("Pallas ConvMeanPool mismatch vs reference")

    print("KERNEL_OK")
</pallas_src>

<mosaic_0001>
module attributes {stable_mosaic.version = 11 : i64} {
  func.func @conv_meanpool_kernel(%arg0: i32, %arg1: memref<8x64xf32, #tpu.memory_space<vmem>>, %arg2: memref<8x1xf32, #tpu.memory_space<vmem>>, %arg3: memref<64x128xf32, #tpu.memory_space<vmem>>, %arg4: memref<8x128xf32, #tpu.memory_space<vmem>>) attributes {dimension_semantics = [#tpu.dimension_semantics<parallel>], iteration_bounds = array<i64: 1>, scalar_prefetch = 0 : i64, scratch_operands = 0 : i64, tpu.core_type = #tpu.core_type<tc>, window_params = [{pipeline_mode = #tpu.pipeline_mode<synchronous>, transform_indices = @transform_0, window_bounds = array<i64: 8, 64>}, {pipeline_mode = #tpu.pipeline_mode<synchronous>, transform_indices = @transform_1, window_bounds = array<i64: 8, 1>}, {transform_indices = @transform_2, window_bounds = array<i64: 64, 128>}, {transform_indices = @transform_3, window_bounds = array<i64: 8, 128>}]} {
    %c0 = arith.constant 0 : index
    %c0_0 = arith.constant 0 : index
    %0 = vector.load %arg1[%c0, %c0_0] : memref<8x64xf32, #tpu.memory_space<vmem>>, vector<8x64xf32>
    %c0_1 = arith.constant 0 : index
    %c0_2 = arith.constant 0 : index
    %1 = vector.load %arg3[%c0_1, %c0_2] : memref<64x128xf32, #tpu.memory_space<vmem>>, vector<64x128xf32>
    %cst = arith.constant dense<0.000000e+00> : vector<8x128xf32>
    %2 = tpu.matmul %0, %1, %cst {dimension_numbers = #tpu.dot_dimension_numbers<[1], [0], [0], [1], [0, 0, 1, 1], [], []>} : vector<8x64xf32>, vector<64x128xf32>, vector<8x128xf32> -> vector<8x128xf32>
    %c0_3 = arith.constant 0 : index
    %c0_4 = arith.constant 0 : index
    %3 = vector.load %arg2[%c0_3, %c0_4] : memref<8x1xf32, #tpu.memory_space<vmem>>, vector<8x1xf32>
    %4 = vector.broadcast %3 : vector<8x1xf32> to vector<8x128xf32>
    %5 = arith.addf %2, %4 : vector<8x128xf32>
    %c0_5 = arith.constant 0 : index
    %c0_6 = arith.constant 0 : index
    %6 = vector.load %arg4[%c0_5, %c0_6] : memref<8x128xf32, #tpu.memory_space<vmem>>, vector<8x128xf32>
    tpu.vector_store %arg4[%c0_5, %c0_6], %5 {strides = array<i32>} : memref<8x128xf32, #tpu.memory_space<vmem>>, vector<8x128xf32>,
    return
  }
  func.func @transform_0(%arg0: i32) -> (i32, i32) {
    %c0_i32 = arith.constant 0 : i32
    %c0_i32_0 = arith.constant 0 : i32
    %c0_i32_1 = arith.constant 0 : i32
    return %c0_i32, %c0_i32_0 : i32, i32
  }
  func.func @transform_1(%arg0: i32) -> (i32, i32) {
    %c0_i32 = arith.constant 0 : i32
    %c0_i32_0 = arith.constant 0 : i32
    %c0_i32_1 = arith.constant 0 : i32
    return %c0_i32, %c0_i32_0 : i32, i32
  }
  func.func @transform_2(%arg0: i32) -> (i32, i32) {
    %c0_i32 = arith.constant 0 : i32
    %c0_i32_0 = arith.constant 0 : i32
    return %c0_i32, %arg0 : i32, i32
  }
  func.func @transform_3(%arg0: i32) -> (i32, i32) {
    %c0_i32 = arith.constant 0 : i32
    %c0_i32_0 = arith.constant 0 : i32
    return %c0_i32, %arg0 : i32, i32
  }
}

</mosaic_0001>

<bundles_post_ra>
// kernel: conv_mean_pool.1
= control target key start
LH: loop header
LB: loop body
LE: loop exit
PB: predicated region body
PF: predicated region fallthrough
CT: control target
= control target key end

     0   :  { %v141_v0 = vmov 0.0   ;;  %vm142_vm0 = vmmov 0   ;;  %v143_v3 = vmov 0   ;;  %vm29_vm1 = vcmask 523264   ;;  %s197_s2 = inlined_call_operand.vmem [shape: f32[64,128], index: 2, kind: input, shape index: {}]   ;;  %s198_s1 = inlined_call_operand.vmem [shape: f32[8,1], index: 1, kind: input, shape index: {}]   ;;  %s199_s0 = inlined_call_operand.vmem [shape: f32[8,64], index: 0, kind: input, shape index: {}]   ;;  %s200_s3 = inlined_call_operand.vmem [shape: f32[8,128], index: 3, kind: output, shape index: {}]  }
   0x1   :  { %118 = vmatprep.subr.mxu0 %v141_v0  ;;  %v22_v1 = vld [vmem:[%s197_s2 + $0x38] sm:$0xff]  ;;  %v21_v2 = vld [vmem:[%s197_s2 + $0x30] sm:$0xff]  ;;  %134 = vmatprep.mubr.msk.f32.mxu0 %vm142_vm0, %v141_v0  ;;  %v20_v4 = vld [vmem:[%s197_s2 + $0x28] sm:$0xff] }
   0x2   :  { %119 = vmatpush3.msra.mxu0 %v22_v1  ;;  %140 = vset.pattern.permute.xlu0 %v143_v3  ;;  %v23_v5 = vld [vmem:[%s198_s1] sm:$0xff]  ;;  %v18_v7 = vld [vmem:[%s197_s2 + $0x18] sm:$0xff]  ;;  %v17_v8 = vld [vmem:[%s197_s2 + $0x10] sm:$0xff] }
   0x3   :  { %120 = vmatprep.subr.mxu0 %v141_v0  ;;  %v19_v6 = vld [vmem:[%s197_s2 + $0x20] sm:$0xff]  ;;  %26 = vperm.xlu0 %140, %v23_v5   ;;  %v16_v9 = vld [vmem:[%s197_s2 + $0x8] sm:$0xff] }
   0x4   :  { %121 = vmatpush3.msra.mxu0 %v21_v2  ;;  %v15_v10 = vld [vmem:[%s197_s2] sm:$0xff] }
   0x5   :  { %122 = vmatprep.subr.mxu0 %v141_v0  ;;  %v14_v11 = vld [vmem:[%s199_s0] sm:$0xff] }
   0x6   :  { %123 = vmatpush3.msra.mxu0 %v20_v4 }
   0x7   :  { %124 = vmatprep.subr.mxu0 %v141_v0 }
   0x8   :  { %125 = vmatpush3.msra.mxu0 %v19_v6 }
   0x9   :  { %126 = vmatprep.subr.mxu0 %v141_v0 }
   0xa   :  { %127 = vmatpush3.msra.mxu0 %v18_v7 }
   0xb   :  { %128 = vmatprep.subr.mxu0 %v141_v0 }
   0xc   :  { %129 = vmatpush3.msra.mxu0 %v17_v8 }
   0xd   :  { %130 = vmatprep.subr.mxu0 %v141_v0 }
   0xe   :  { %131 = vmatpush3.msra.mxu0 %v16_v9 }
   0xf   :  { %132 = vmatprep.subr.mxu0 %v141_v0 }
  0x10   :  { %133 = vmatpush3.msra.mxu0 %v15_v10 }
  0x11   :  { %135 = vmatmul.mubr.msk.f32.vlgmr.msra.gmra.mxu0 %vm29_vm1, %v14_v11 }
  0x7e   :  { %v27_v12 = vpop.permute.xlu0 %26 }
  0xd1   :  { %v99_v13 = vpop.f32.mrf.mxu0 }
  0xd2   :  { %v100_v14 = vadd.f32 %v99_v13, %v27_v12 }
  0xd3   :  { %v136_v15 = vpop.f32.mrf.mxu0 }
  0xd4   :  { %103 = vst [vmem:[%s200_s3] sm:$0xff] %v100_v14 }

</bundles_post_ra>
